<compile_context>
chip_gen: v7x
topology: tpu7x:2x2x1
jax: 0.10.0
libtpu: 0.0.40
codegen_flags: <defaults>
</compile_context>

<pallas_src>
import functools

import jax
import jax.numpy as jnp
from jax import lax
from jax.experimental import pallas as pl
from jax.experimental.pallas import tpu as pltpu


_INV_SQRT2 = 0.7071067811865476


def _gelu(x, approximate=False):
    if approximate:
        # tanh approximation lands on the EUP slot instead of a long erf
        # VALU polynomial.  Precision-affecting; off by default.
        return jax.nn.gelu(x, approximate=True)
    # PyTorch nn.GELU() default = exact (erf) GELU; computed in f32.
    return 0.5 * x * (1.0 + lax.erf(x * _INV_SQRT2))


# ----------------------------------------------------------------------------
# Kernels
# ----------------------------------------------------------------------------

def _ff_resident_kernel(x_ref, w1_ref, b1_ref, w2_ref, b2_ref, o_ref, *,
                        approximate):
    # x_ref:  (tm, D) token tile (native dtype)
    # w1_ref: (D, H)  resident first-linear weight
    # b1_ref: (1, H)
    # w2_ref: (H, D)  resident second-linear weight
    # b2_ref: (1, D)
    # o_ref:  (tm, D)
    h = jnp.dot(x_ref[...], w1_ref[...], preferred_element_type=jnp.float32)
    h = _gelu(h + b1_ref[...].astype(jnp.float32), approximate)
    # Cast GELU output back to the weight dtype for the MXU (no-op for f32,
    # native fast path for bf16); accumulate in f32.
    y = jnp.dot(h.astype(w2_ref.dtype), w2_ref[...],
                preferred_element_type=jnp.float32)
    o_ref[...] = (y + b2_ref[...].astype(jnp.float32)).astype(o_ref.dtype)


def _ff_streaming_kernel(x_ref, w1_ref, b1_ref, w2_ref, b2_ref, o_ref, acc_ref,
                         *, approximate):
    # Fallback for large weights: H is tiled on an "arbitrary" grid axis and
    # partial results accumulate in an f32 (tm, D) scratch.
    h_idx = pl.program_id(1)

    @pl.when(h_idx == 0)
    def _():
        acc_ref[...] = jnp.zeros_like(acc_ref)

    h = jnp.dot(x_ref[...], w1_ref[...], preferred_element_type=jnp.float32)
    h = _gelu(h + b1_ref[...].astype(jnp.float32), approximate)
    acc_ref[...] += jnp.dot(h.astype(w2_ref.dtype), w2_ref[...],
                            preferred_element_type=jnp.float32)

    @pl.when(h_idx == pl.num_programs(1) - 1)
    def _():
        o_ref[...] = (acc_ref[...] + b2_ref[...].astype(jnp.float32)
                      ).astype(o_ref.dtype)


# ----------------------------------------------------------------------------
# Tiling helpers
# ----------------------------------------------------------------------------

def _round_up(x, m):
    return ((x + m - 1) // m) * m


def _cdiv(a, b):
    return -(-a // b)


def _sublane_multiple(dtype):
    # Rows per packed sublane tile: f32 -> 8, bf16 -> 16, int8/fp8 -> 32.
    return max(8, 32 // jnp.dtype(dtype).itemsize)


def _tpu_vmem_capacity():
    try:
        return int(pltpu.get_tpu_info().vmem_capacity_bytes)
    except Exception:
        return 64 * 1024 * 1024   # conservative (v7x-sized) fallback


def _choose_row_tiling(N, target, sublane, min_tiles=2):
    """Pick (tm, n_pad): prefer no padding and >= min_tiles row tiles."""
    target = max(sublane, (max(target, sublane) // sublane) * sublane)
    n_ceil = _round_up(N, sublane)
    if n_ceil <= target:
        # Everything fits in one target-sized tile; split so the "parallel"
        # row axis can shard across TensorCores (cheap on single-TC chips).
        tiles = min_tiles if n_ceil >= min_tiles * sublane else 1
        tm = _round_up(_cdiv(n_ceil, tiles), sublane)
    else:
        tm = target
        if N % sublane == 0:
            # Prefer a tile that divides N exactly -> no pad, no output slice.
            t = target
            while t >= max(sublane, target // 2):
                if N % t == 0:
                    tm = t
                    break
                t -= sublane
    n_pad = _round_up(N, tm)
    if n_pad // tm < min_tiles and n_pad >= min_tiles * sublane:
        tm = _round_up(_cdiv(n_pad, min_tiles), sublane)
        n_pad = _round_up(N, tm)
    return tm, n_pad


def _pick_hidden_tile(H, target):
    """Largest tile <= target dividing H; prefer 256 granules (v6e/v7x MXU),
    then 128 (v5e); else full H."""
    if H <= target:
        return H
    for granule in (256, 128):
        t = (target // granule) * granule
        while t >= granule:
            if H % t == 0:
                return t
            t -= granule
    return H


# ----------------------------------------------------------------------------
# Wrapper
# ----------------------------------------------------------------------------

def feedforward(x, w1, b1, w2, b2, *, block_rows=512, block_hidden=512,
                weights_resident=None, approximate_gelu=False):
    """x: [B, S, D]; w1: [D, H]; b1: [H]; w2: [H, D]; b2: [D] -> [B, S, D]."""
    B, S, D = x.shape
    H = w1.shape[1]
    N = B * S

    isx = x.dtype.itemsize
    isw = w1.dtype.itemsize
    sublane = _sublane_multiple(x.dtype)

    cap = _tpu_vmem_capacity()
    headroom = int(cap * 0.80)   # ~51 MiB on v7x, ~102 MiB on v5e/v6e

    tm, n_pad = _choose_row_tiling(N, block_rows, sublane, min_tiles=2)

    # Resident-weights VMEM estimate: double-buffered activation tiles,
    # weights (counted x2 conservatively), f32 GELU intermediate + f32 result.
    w_bytes = (D * H + H + H * D + D) * isw
    est_resident = (2 * tm * D * 2 * isx     # x tile + out tile, double-buffer
                    + 2 * w_bytes            # w1/b1/w2/b2 (conservative x2)
                    + tm * H * 4             # (tm, H) f32 GELU intermediate
                    + tm * D * 4)            # (tm, D) f32 second-matmul result
    if weights_resident is None:
        weights_resident = est_resident <= int(headroom * 0.75)

    x2 = x.reshape(N, D)
    if n_pad != N:
        # Fallback only: the row-tile chooser avoids this whenever N is a
        # multiple of the sublane count.
        x2 = jnp.pad(x2, ((0, n_pad - N), (0, 0)))

    b1_2d = b1.reshape(1, H)
    b2_2d = b2.reshape(1, D)
    grid_rows = n_pad // tm

    if weights_resident:
        vmem_limit = max(32 * 1024 * 1024,
                         min(headroom, int(est_resident * 1.5)))
        out = pl.pallas_call(
            functools.partial(_ff_resident_kernel,
                              approximate=approximate_gelu),
            out_shape=jax.ShapeDtypeStruct((n_pad, D), x.dtype),
            grid_spec=pltpu.PrefetchScalarGridSpec(
                num_scalar_prefetch=0,
                grid=(grid_rows,),
                in_specs=[
                    pl.BlockSpec((tm, D), lambda i: (i, 0)),  # x tile
                    pl.BlockSpec((D, H), lambda i: (0, 0)),   # w1 (resident)
                    pl.BlockSpec((1, H), lambda i: (0, 0)),   # b1
                    pl.BlockSpec((H, D), lambda i: (0, 0)),   # w2 (resident)
                    pl.BlockSpec((1, D), lambda i: (0, 0)),   # b2
                ],
                out_specs=pl.BlockSpec((tm, D), lambda i: (i, 0)),
            ),
            compiler_params=pltpu.CompilerParams(
                dimension_semantics=("parallel",),
                vmem_limit_bytes=vmem_limit),
        )(x2, w1, b1_2d, w2, b2_2d)
    else:
        th = _pick_hidden_tile(H, block_hidden)
        est_stream = (2 * (tm * D * isx + D * th * isw + th * isw
                           + th * D * isw + D * isw + tm * D * isx)
                      + tm * D * 4       # f32 accumulator scratch
                      + tm * th * 4)     # f32 GELU intermediate
        vmem_limit = max(32 * 1024 * 1024, min(headroom, int(est_stream * 1.5)))
        # TODO(synk): if streaming-weight DMA ever dominates, raise the weight
        # BlockSpecs' depth with pipeline_mode=pl.Buffered(3).
        out = pl.pallas_call(
            functools.partial(_ff_streaming_kernel,
                              approximate=approximate_gelu),
            out_shape=jax.ShapeDtypeStruct((n_pad, D), x.dtype),
            grid_spec=pltpu.PrefetchScalarGridSpec(
                num_scalar_prefetch=0,
                grid=(grid_rows, H // th),
                in_specs=[
                    pl.BlockSpec((tm, D), lambda i, h: (i, 0)),  # x tile
                    pl.BlockSpec((D, th), lambda i, h: (0, h)),  # w1 h-slice
                    pl.BlockSpec((1, th), lambda i, h: (0, h)),  # b1 h-slice
                    pl.BlockSpec((th, D), lambda i, h: (h, 0)),  # w2 h-slice
                    pl.BlockSpec((1, D), lambda i, h: (0, 0)),   # b2
                ],
                out_specs=pl.BlockSpec((tm, D), lambda i, h: (i, 0)),
                scratch_shapes=[pltpu.VMEM((tm, D), jnp.float32)],
            ),
            compiler_params=pltpu.CompilerParams(
                dimension_semantics=("parallel", "arbitrary"),
                vmem_limit_bytes=vmem_limit),
        )(x2, w1, b1_2d, w2, b2_2d)

    if n_pad != N:
        out = out[:N]
    return out.reshape(B, S, D)


# ----------------------------------------------------------------------------
# Reference + init
# ----------------------------------------------------------------------------

def feedforward_ref(x, w1, b1, w2, b2):
    h = jnp.einsum("bsd,dh->bsh", x.astype(jnp.float32),
                   w1.astype(jnp.float32)) + b1.astype(jnp.float32)
    h = _gelu(h)
    y = jnp.einsum("bsh,hd->bsd", h, w2.astype(jnp.float32)) + b2.astype(
        jnp.float32)
    return y.astype(x.dtype)


def init_linear_params(key, fan_in, fan_out, dtype=jnp.float32):
    # Matches torch.nn.Linear default init: U(-1/sqrt(fan_in), 1/sqrt(fan_in)).
    kw, kb = jax.random.split(key)
    bound = 1.0 / float(fan_in) ** 0.5
    # PyTorch stores weight as (out, in); we keep (in, out) for x @ W.
    w = jax.random.uniform(kw, (fan_in, fan_out), dtype, -bound, bound)
    b = jax.random.uniform(kb, (fan_out,), dtype, -bound, bound)
    return w, b


if __name__ == "__main__":
    key = jax.random.PRNGKey(0)

    # --- Small test (module-typical toy shapes; resident-weights path) ------
    B, S, dim, hidden_dim = 2, 8, 32, 64
    kx, k1, k2, key = jax.random.split(key, 4)
    x = jax.random.normal(kx, (B, S, dim), jnp.float32)
    w1, b1 = init_linear_params(k1, dim, hidden_dim)   # Linear(dim, hidden_dim)
    w2, b2 = init_linear_params(k2, hidden_dim, dim)   # Linear(hidden_dim, dim)

    y = jax.block_until_ready(feedforward(x, w1, b1, w2, b2))
    y_ref = feedforward_ref(x, w1, b1, w2, b2)
    assert y.shape == (B, S, dim)
    assert jnp.allclose(y, y_ref, atol=1e-5, rtol=1e-5), "mismatch (small)"

    # --- Larger test: row tiling + resident weights, no pad / no slice ------
    B2, S2, dim2, hidden2 = 2, 200, 128, 512           # N=400 -> 2 tiles of 200
    kx, k1, k2, key = jax.random.split(key, 4)
    xb = jax.random.normal(kx, (B2, S2, dim2), jnp.float32)
    w1b, b1b = init_linear_params(k1, dim2, hidden2)
    w2b, b2b = init_linear_params(k2, hidden2, dim2)

    yb = jax.block_until_ready(feedforward(xb, w1b, b1b, w2b, b2b))
    yb_ref = feedforward_ref(xb, w1b, b1b, w2b, b2b)
    assert jnp.allclose(yb, yb_ref, atol=1e-4, rtol=1e-4), "mismatch (resident)"

    # --- Streaming-weights fallback path (forced) ---------------------------
    B3, S3, dim3, hidden3 = 2, 128, 128, 1024
    kx, k1, k2, key = jax.random.split(key, 4)
    xc = jax.random.normal(kx, (B3, S3, dim3), jnp.float32)
    w1c, b1c = init_linear_params(k1, dim3, hidden3)
    w2c, b2c = init_linear_params(k2, hidden3, dim3)

    yc = jax.block_until_ready(
        feedforward(xc, w1c, b1c, w2c, b2c,
                    block_rows=128, block_hidden=512, weights_resident=False))
    yc_ref = feedforward_ref(xc, w1c, b1c, w2c, b2c)
    assert jnp.allclose(yc, yc_ref, atol=1e-4, rtol=1e-4), "mismatch (streaming)"

    print("KERNEL_OK")
</pallas_src>

<mosaic_0001>
module attributes {stable_mosaic.version = 11 : i64} {
  func.func @_ff_resident_kernel(%arg0: i32, %arg1: memref<8x32xf32, #tpu.memory_space<vmem>>, %arg2: memref<32x64xf32, #tpu.memory_space<vmem>>, %arg3: memref<1x64xf32, #tpu.memory_space<vmem>>, %arg4: memref<64x32xf32, #tpu.memory_space<vmem>>, %arg5: memref<1x32xf32, #tpu.memory_space<vmem>>, %arg6: memref<8x32xf32, #tpu.memory_space<vmem>>) attributes {dimension_semantics = [#tpu.dimension_semantics<parallel>], iteration_bounds = array<i64: 2>, scalar_prefetch = 0 : i64, scratch_operands = 0 : i64, tpu.core_type = #tpu.core_type<tc>, window_params = [{transform_indices = @transform_0, window_bounds = array<i64: 8, 32>}, {pipeline_mode = #tpu.pipeline_mode<synchronous>, transform_indices = @transform_1, window_bounds = array<i64: 32, 64>}, {pipeline_mode = #tpu.pipeline_mode<synchronous>, transform_indices = @transform_2, window_bounds = array<i64: 1, 64>}, {pipeline_mode = #tpu.pipeline_mode<synchronous>, transform_indices = @transform_3, window_bounds = array<i64: 64, 32>}, {pipeline_mode = #tpu.pipeline_mode<synchronous>, transform_indices = @transform_4, window_bounds = array<i64: 1, 32>}, {transform_indices = @transform_5, window_bounds = array<i64: 8, 32>}]} {
    %c0 = arith.constant 0 : index
    %c0_0 = arith.constant 0 : index
    %0 = vector.load %arg1[%c0, %c0_0] : memref<8x32xf32, #tpu.memory_space<vmem>>, vector<8x32xf32>
    %c0_1 = arith.constant 0 : index
    %c0_2 = arith.constant 0 : index
    %1 = vector.load %arg2[%c0_1, %c0_2] : memref<32x64xf32, #tpu.memory_space<vmem>>, vector<32x64xf32>
    %cst = arith.constant dense<0.000000e+00> : vector<8x64xf32>
    %2 = tpu.matmul %0, %1, %cst {dimension_numbers = #tpu.dot_dimension_numbers<[1], [0], [0], [1], [0, 0, 1, 1], [], []>} : vector<8x32xf32>, vector<32x64xf32>, vector<8x64xf32> -> vector<8x64xf32>
    %c0_3 = arith.constant 0 : index
    %c0_4 = arith.constant 0 : index
    %3 = vector.load %arg3[%c0_3, %c0_4] : memref<1x64xf32, #tpu.memory_space<vmem>>, vector<1x64xf32>
    %4 = vector.broadcast %3 : vector<1x64xf32> to vector<8x64xf32>
    %5 = arith.addf %2, %4 : vector<8x64xf32>
    %cst_5 = arith.constant 5.000000e-01 : f32
    %6 = vector.broadcast %cst_5 : f32 to vector<8x64xf32>
    %7 = arith.mulf %6, %5 : vector<8x64xf32>
    %cst_6 = arith.constant 0.707106769 : f32
    %8 = vector.broadcast %cst_6 : f32 to vector<8x64xf32>
    %9 = arith.mulf %5, %8 : vector<8x64xf32>
    %10 = math.erf %9 : vector<8x64xf32>
    %cst_7 = arith.constant 1.000000e+00 : f32
    %11 = vector.broadcast %cst_7 : f32 to vector<8x64xf32>
    %12 = arith.addf %11, %10 : vector<8x64xf32>
    %13 = arith.mulf %7, %12 : vector<8x64xf32>
    %c0_8 = arith.constant 0 : index
    %c0_9 = arith.constant 0 : index
    %14 = vector.load %arg4[%c0_8, %c0_9] : memref<64x32xf32, #tpu.memory_space<vmem>>, vector<64x32xf32>
    %cst_10 = arith.constant dense<0.000000e+00> : vector<8x32xf32>
    %15 = tpu.matmul %13, %14, %cst_10 {dimension_numbers = #tpu.dot_dimension_numbers<[1], [0], [0], [1], [0, 0, 1, 1], [], []>} : vector<8x64xf32>, vector<64x32xf32>, vector<8x32xf32> -> vector<8x32xf32>
    %c0_11 = arith.constant 0 : index
    %c0_12 = arith.constant 0 : index
    %16 = vector.load %arg5[%c0_11, %c0_12] : memref<1x32xf32, #tpu.memory_space<vmem>>, vector<1x32xf32>
    %17 = vector.broadcast %16 : vector<1x32xf32> to vector<8x32xf32>
    %18 = arith.addf %15, %17 : vector<8x32xf32>
    %c0_13 = arith.constant 0 : index
    %c0_14 = arith.constant 0 : index
    %19 = vector.load %arg6[%c0_13, %c0_14] : memref<8x32xf32, #tpu.memory_space<vmem>>, vector<8x32xf32>
    tpu.vector_store %arg6[%c0_13, %c0_14], %18 {strides = array<i32>} : memref<8x32xf32, #tpu.memory_space<vmem>>, vector<8x32xf32>,
    return
  }
  func.func @transform_0(%arg0: i32) -> (i32, i32) {
    %c0_i32 = arith.constant 0 : i32
    %c0_i32_0 = arith.constant 0 : i32
    return %arg0, %c0_i32 : i32, i32
  }
  func.func @transform_1(%arg0: i32) -> (i32, i32) {
    %c0_i32 = arith.constant 0 : i32
    %c0_i32_0 = arith.constant 0 : i32
    %c0_i32_1 = arith.constant 0 : i32
    return %c0_i32, %c0_i32_0 : i32, i32
  }
  func.func @transform_2(%arg0: i32) -> (i32, i32) {
    %c0_i32 = arith.constant 0 : i32
    %c0_i32_0 = arith.constant 0 : i32
    %c0_i32_1 = arith.constant 0 : i32
    return %c0_i32, %c0_i32_0 : i32, i32
  }
  func.func @transform_3(%arg0: i32) -> (i32, i32) {
    %c0_i32 = arith.constant 0 : i32
    %c0_i32_0 = arith.constant 0 : i32
    %c0_i32_1 = arith.constant 0 : i32
    return %c0_i32, %c0_i32_0 : i32, i32
  }
  func.func @transform_4(%arg0: i32) -> (i32, i32) {
    %c0_i32 = arith.constant 0 : i32
    %c0_i32_0 = arith.constant 0 : i32
    %c0_i32_1 = arith.constant 0 : i32
    return %c0_i32, %c0_i32_0 : i32, i32
  }
  func.func @transform_5(%arg0: i32) -> (i32, i32) {
    %c0_i32 = arith.constant 0 : i32
    %c0_i32_0 = arith.constant 0 : i32
    return %arg0, %c0_i32 : i32, i32
  }
}

</mosaic_0001>

<bundles_post_ra>
// kernel: tpu_custom_call.1
= control target key start
LH: loop header
LB: loop body
LE: loop exit
PB: predicated region body
PF: predicated region fallthrough
CT: control target
= control target key end

     0   :  { %10 = vsyncpa [#allocation3], 0  ;;  %s836_s0 = inlined_call_operand.vmem [shape: f32[16,32], index: 0, kind: input, shape index: {}]   ;;  %s837_s1 = inlined_call_operand.vmem [shape: f32[32,64], index: 1, kind: input, shape index: {}]   ;;  %s838_s2 = inlined_call_operand.vmem [shape: f32[1,64], index: 2, kind: input, shape index: {}]   ;;  %s839_s3 = inlined_call_operand.vmem [shape: f32[64,32], index: 3, kind: input, shape index: {}]   ;;  %s840_s4 = inlined_call_operand.vmem [shape: f32[1,32], index: 4, kind: input, shape index: {}]   ;;  %s841_s5 = inlined_call_operand.hbm [shape: f32[16,32], index: 5, kind: output, shape index: {}]  }
   0x1   :  { %12 = vsyncpa [#allocation3 + $0x1], 0  ;;  %s692_s18 = smov 0   ;;  %s694_s19 = smov 0  }
   0x2   :  { %s696_s20 = smov 0   ;;  %s698_s21 = smov 0  }
   0x3 LB: > { %s713_s22 = sadd.s32 4294967295, %s656_s21   ;;  %s474_s23 = sadd.s32 4294967294, %s656_s21   ;;  %s656_s21 = sphi %s698_s21, %s847_s21   ;;  %s652_s20 = sphi %s696_s20, %s846_s20   ;;  %s648_s19 = sphi %s694_s19, %s845_s19   ;;  %s644_s18 = sphi %s692_s18, %s844_s18  }
   0x4   : > { %s717_s24 = sadd.s32 1, %s656_s21   ;;  %s135_s25 = sadd.s32 1, %s652_s20 }
   0x5   : > { %s132_s26 = ssub.s32 %s656_s21, %s717_s24  ;;  %p145_p0 = scmp.ne.s32.totalorder %s652_s20, %s648_s19 }
   0x6   : > { %p133_p1 = scmp.eq.s32.totalorder %s132_s26, 0  ;;  %p146_p2 = scmp.eq.s32.totalorder %s713_s22, 1 }
   0x7   : > { %p151_p3 = scmp.ne.s32.totalorder %s648_s19, %s644_s18  ;;  %p152_p4 = scmp.eq.s32.totalorder %s474_s23, 1 }
   0x8   : > { %s728_s27 = scalar_select %p133_p1, %s652_s20, %s135_s25  }
   0x9   : > { %p730_p5 = por %p146_p2, %p145_p0  ;;  %p734_p6 = por %p152_p4, %p151_p3 }
   0xa   : > { %p477_p7 = scmp.ge.s32.totalorder %s656_s21, 1  ;;  %p189_p8 = scmp.lt.s32.totalorder %s656_s21, 3 }
   0xc   : > { %p190_p9 = pnand %p477_p7, %p189_p8 }
   0xd   : > { %v221_v0 = vld [vmem:[%s837_s1] sm:$0xff] (!%p190_p9)  ;;  %v222_v1 = vld [vmem:[%s837_s1 + $0x8] sm:$0xff] (!%p190_p9)  ;;  %v223_v2 = vld [vmem:[%s837_s1 + $0x10] sm:$0xff] (!%p190_p9)  ;;  %v658_v3 = vmov (!%p190_p9), 0.0|0.0   ;;  %vm659_vm0 = vmmov (!%p190_p9), 0   ;;  %v660_v6 = vmov (!%p190_p9), 0.0  }
   0xe   : > { %193 = sbr.rel (%p190_p9) target bundleno = 485 (0x1e5), region = 40  ;;  %532 = vmatprep.subr.bf16.mxu0 (!%p190_p9), %v658_v3  ;;  %v533_v4 = vpack.c.bf16 (!%p190_p9), %v222_v1, %v221_v0  ;;  %v224_v5 = vld [vmem:[%s837_s1 + $0x18] sm:$0xff] (!%p190_p9)  ;;  %510 = vmatprep.mubr.msk.f32.mxu0 (!%p190_p9), %vm659_vm0, %v660_v6  ;;  %p216_p10 = scmp.lt.s32.totalorder (!%p190_p9), %s713_s22, 1  ;;  %vm232_vm1 = vcmask (!%p190_p9), 261120   ;;  %v311_v9 = vld [vmem:[%s839_s3] sm:$0xff] (!%p190_p9)  ;;  %v312_v10 = vld [vmem:[%s839_s3 + $0x8] sm:$0xff] (!%p190_p9) }
   0xf   : > { %538 = vmatprep.subr.bf16.mxu1 (!%p190_p9), %v658_v3  ;;  %529 = vmatprep.mubr.msk.f32.mxu1 (!%p190_p9), %vm659_vm0, %v660_v6  ;;  %v536_v7 = vpack.c.bf16 (!%p190_p9), %v224_v5, %v223_v2  ;;  %v539_v11 = vpack.c.bf16 (!%p190_p9), %v312_v10, %v311_v9  ;;  %v313_v12 = vld [vmem:[%s839_s3 + $0x10] sm:$0xff] (!%p190_p9)  ;;  %v314_v13 = vld [vmem:[%s839_s3 + $0x18] sm:$0xff] (!%p190_p9)  ;;  %v315_v15 = vld [vmem:[%s839_s3 + $0x20] sm:$0xff] (!%p190_p9)  ;;  %vm326_vm2 = vcmask (!%p190_p9), 523264   ;;  %s213_s26 = sand.u32 (!%p190_p9), 1, %s648_s19   ;;  %s485_s8 = sshll.u32 (!%p190_p9), %s713_s22, 7 }
  0x10   : > { %534 = vmatpush3.bf16.msra.mxu0 (!%p190_p9), %v533_v4  ;;  %v542_v14 = vpack.c.bf16 (!%p190_p9), %v314_v13, %v313_v12  ;;  %v316_v16 = vld [vmem:[%s839_s3 + $0x28] sm:$0xff] (!%p190_p9)  ;;  %v317_v18 = vld [vmem:[%s839_s3 + $0x30] sm:$0xff] (!%p190_p9)  ;;  %v318_v19 = vld [vmem:[%s839_s3 + $0x38] sm:$0xff] (!%p190_p9)  ;;  %s478_s30 = sshll.u32 (!%p190_p9), %s213_s26, 3 }
  0x11   : > { %535 = vmatprep.subr.bf16.mxu0 (!%p190_p9), %v658_v3  ;;  %540 = vmatpush3.bf16.msra.mxu1 (!%p190_p9), %v539_v11  ;;  %v545_v17 = vpack.c.bf16 (!%p190_p9), %v316_v16, %v315_v15  ;;  %v548_v20 = vpack.c.bf16 (!%p190_p9), %v318_v19, %v317_v18  ;;  %v480_v21 = vld [vmem:[%s838_s2] ss:$0 sm:$0xff] (!%p190_p9)  ;;  %s215_s9 = scalar_lea.vmem (!%p190_p9), [#allocation2], %s478_s30 }
  0x12   : > { %541 = vmatprep.subr.bf16.mxu1 (!%p190_p9), %v658_v3  ;;  %v482_v30 = vld [vmem:[%s840_s4] ss:$0 sm:$0xff] (!%p190_p9)  ;;  %s415_s10 = sshll.u32 (!%p190_p9), %s215_s9, 4  ;;  %s795_s10 = int_to_ptr.vmem [resolvable:$true] %s415_s10 }
  0x13   : > { %s594_s15 = scalar_lea.vmem (!%p190_p9), %s795_s10, 128 }
  0x14   : > { %537 = vmatpush3.bf16.msra.mxu0 (!%p190_p9), %v536_v7  ;;  %p595_p11 = scmp.ne.s32.totalorder (!%p190_p9), %s795_s10, %s594_s15 }
  0x15   : > { %s217_s13 = scalar_select %p216_p10, %s713_s22, 1  ;;  %543 = vmatpush3.bf16.msra.mxu1 %v542_v14 }
  0x16   : > { %544 = vmatprep.subr.bf16.mxu1 %v658_v3  ;;  %p596_p12 = pnand %p595_p11, %p730_p5  ;;  %s661_s22 = smov [#allocation2]  }
  0x17   : > { %s479_s14 = sshll.u32 %s217_s13, 3  ;;  %s793_s13 = scalar_lea.hbm %s841_s5, %s485_s8 }
  0x18   : > { %s219_s17 = scalar_lea.vmem %s836_s0, %s479_s14  ;;  %s402_s14 = scalar_lea.sflag [#allocation3], %s213_s26 }
  0x19   : > { %v220_v8 = vld [vmem:[%s219_s17] sm:$0xff]  ;;  %546 = vmatpush3.bf16.msra.mxu1 %v545_v17  ;;  %p597_p13 = pneg %p596_p12  ;;  %s598_s16 = sshll.u32 %s661_s22, 4  ;;  %s599_s16 = int_to_ptr.vmem [resolvable:$false] %s598_s16 }
  0x1a   : > { %511 = vmatmul.mubr.msk.f32.vlgmr.msra.gmra.mrb[0].mxu0 %vm232_vm1, %v220_v8  ;;  %547 = vmatprep.subr.bf16.mxu1 %v658_v3  ;;  %s600_s17 = scalar_lea.vmem %s599_s16, 256  ;;  %p601_p0 = scmp.lt.s32.totalorder %s795_s10, %s599_s16 }
  0x1b   : > { %p602_p1 = scmp.lt.s32.totalorder %s600_s17, %s594_s15 }
  0x1d   : > { %549 = vmatpush3.bf16.msra.mxu1 %v548_v20  ;;  %p603_p2 = por %p602_p1, %p601_p0 }
  0x1f   : > { %p604_p3 = pnand %p603_p2, %p597_p13 }
  0xed   : > { %v302_v22 = vpop.f32.mrb[0].mxu0 }
  0xee   : > { %v303_v23 = vadd.f32 %v480_v21, %v302_v22  ;;  %v512_v24 = vpop.f32.mrb[1].mxu0 }
  0xf0   : > { %v307_v25 = vmul.f32 0.70710677, %v303_v23  ;;  %v306_v27 = vmul.f32 0.5, %v303_v23 }
  0xf2   : > { %592 = verf.f32 %v307_v25 }
  0xfc   : > { %v593_v26 = vpop.eup %592 }
  0xfd   : > { %v309_v28 = vadd.f32 1.0, %v593_v26 }
  0xff   : > { %v310_v29 = vmul.f32 %v309_v28, %v306_v27 }
 0x101   : > { %530 = vmatmul.mubr.msk.f32.vlgmr.msra.gmra.mrb[0].mxu1 %vm326_vm2, %v310_v29 }
 0x1d4   : > { %v396_v31 = vpop.f32.mrb[0].mxu1 }
 0x1d5   : > { %v397_v32 = vadd.f32 %v482_v30, %v396_v31  ;;  %v531_v33 = vpop.f32.mrb[1].mxu1 }
 0x1d7   : > { %400 = vst.msk [vmem:[%s215_s9] sm:$0xff] %vm232_vm1, %v397_v32 }
 0x1d8   : > { %607 = shalt.err (!%p604_p3)
}
 0x1d9   : > { %s608_s23 = scalar_lea.hbm %s793_s13, 128  ;;  %s612_s30 = scalar_lea.hbm %s841_s5, 256 }
 0x1da   : > { %p609_p4 = scmp.ne.s32.totalorder %s793_s13, %s608_s23  ;;  %p613_p9 = scmp.lt.u32.totalorder %s793_s13, %s841_s5 }
 0x1db   : > { %p614_p10 = scmp.lt.u32.totalorder %s612_s30, %s608_s23  ;;  %p616_p12 = scmp.lt.u32.totalorder %s608_s23, %s793_s13 }
 0x1dc   : > { %p610_p7 = pnand %p609_p4, %p730_p5 }
 0x1dd   : > { %p615_p11 = por %p614_p10, %p613_p9 }
 0x1de   : > { %p611_p8 = pneg %p610_p7 }
 0x1df   : > { %p617_p13 = por %p616_p12, %p615_p11 }
 0x1e1   : > { %p618_p0 = pnand %p617_p13, %p611_p8 }
 0x1e3   : > { %621 = shalt.err (!%p618_p0)
}
 0x1e4   : > { %550 = dma.vmem_to_hbm [thread:$0]  (%p730_p5), %s795_s10, 128, %s793_s13, %s402_s14  }
 0x1e5 PF: > { %p556_p1 = scmp.ge.s32.totalorder %s656_s21, 2  ;;  %s427_s8 = sand.u32 1, %s644_s18  }
 0x1e6   : > { %s428_s9 = scalar_lea.sflag [#allocation3], %s427_s8 }
 0x1e7   : > { %p553_p2 = pnand %p556_p1, %p734_p6 }
 0x1e9   : > { %639 = dma.done.wait (!%p553_p2), %s428_s9, 128  }
 0x1ea   : > { %641 = vsyncadd (!%p553_p2), %s428_s9, 4294967168  ;;  %p15_p3 = scmp.ge.s32.totalorder %s717_s24, 4   ;;  %s844_s18 = smov %s648_s19 }
 0x1eb   : > { %s845_s19 = smov %s652_s20  ;;  %s846_s20 = smov %s728_s27 }
 0x1ec   : > { %s847_s21 = smov %s717_s24  ;;  %17 = sbr.rel (!%p15_p3) target bundleno = 3 (0x3), region = 75 }
 0x1f3   :  { %433 = vsyncpa [#allocation3], 1 }
 0x1f4   :  { %435 = vsyncpa [#allocation3 + $0x1], 1 }

</bundles_post_ra>
